<compile_context>
chip_gen: v5e
topology: v5e:2x2
jax: 0.10.0
libtpu: 0.0.40
codegen_flags: <defaults>
</compile_context>

<pallas_src>
import functools

import jax
import jax.numpy as jnp
from jax.experimental import pallas as pl
from jax.experimental.pallas import tpu as pltpu


def _actor_critic_kernel(
    x_ref, w1_ref, b1_ref, w2_ref, b2_ref, w3_ref, b3_ref, out_ref,
    *, num_actions,
):
    x = x_ref[...]

    # Layer 1 (actor|critic fused along output dim): (TB, in) @ (in, 2H)
    h = jnp.dot(x, w1_ref[...], preferred_element_type=jnp.float32) + b1_ref[...]
    h = jnp.maximum(h, 0.0)

    # Layer 2 (block-diagonal aw2/cw2): (TB, 2H) @ (2H, 2H)
    h = jnp.dot(h, w2_ref[...], preferred_element_type=jnp.float32) + b2_ref[...]
    h = jnp.maximum(h, 0.0)

    # Layer 3: (TB, 2H) @ (2H, A+1). Columns 0..A-1 = actor logits, column A = value.
    fused = jnp.dot(h, w3_ref[...], preferred_element_type=jnp.float32) + b3_ref[...]

    # Numerically-stable softmax over the logit columns only (value column masked).
    col = jax.lax.broadcasted_iota(jnp.int32, fused.shape, 1)
    is_logit = col < num_actions
    m = jnp.max(jnp.where(is_logit, fused, -jnp.inf), axis=-1, keepdims=True)
    e = jnp.where(is_logit, jnp.exp(fused - m), 0.0)
    denom = jnp.sum(e, axis=-1, keepdims=True)
    probs = e * pl.reciprocal(denom, approx=False)

    # Probs in logit columns, raw critic value in the last column.
    out_ref[...] = jnp.where(is_logit, probs, fused).astype(out_ref.dtype)


def pack_params(p):
    """Host-side fusion of actor/critic weights into 3 packed matmuls."""
    H = p["aw1"].shape[1]
    A = p["aw3"].shape[1]

    w1 = jnp.concatenate([p["aw1"], p["cw1"]], axis=1)            # (in, 2H)
    b1 = jnp.concatenate([p["ab1"], p["cb1"]], axis=1)            # (1, 2H)

    w2 = jnp.zeros((2 * H, 2 * H), jnp.float32)
    w2 = w2.at[:H, :H].set(p["aw2"]).at[H:, H:].set(p["cw2"])     # blockdiag
    b2 = jnp.concatenate([p["ab2"], p["cb2"]], axis=1)            # (1, 2H)

    w3 = jnp.zeros((2 * H, A + 1), jnp.float32)
    w3 = w3.at[:H, :A].set(p["aw3"]).at[H:, A:].set(p["cw3"])     # logits | value
    b3 = jnp.concatenate([p["ab3"], p["cb3"]], axis=1)            # (1, A+1)

    return w1, b1, w2, b2, w3, b3


def actor_critic_forward(x, params, *, block_b=1024):
    """ActorCritic forward pass in one Pallas kernel.

    x: (B, num_inputs) float32
    params: dict of actor/critic weights & biases (see init_params)
    returns: (probs (B, num_actions), value (B, 1))
    """
    B, num_inputs = x.shape
    H = params["aw1"].shape[1]
    A = params["aw3"].shape[1]

    w1, b1, w2, b2, w3, b3 = pack_params(params)

    # Batch tile: whole batch if small, otherwise a bounded VMEM tile (multiple of 8).
    # TODO(synk): re-derive block_b against the 64 MiB v7x VMEM if hidden_size grows.
    tb = B if B <= block_b else block_b
    grid = (pl.cdiv(B, tb),)

    kernel = functools.partial(_actor_critic_kernel, num_actions=A)

    out = pl.pallas_call(
        kernel,
        out_shape=jax.ShapeDtypeStruct((B, A + 1), jnp.float32),
        grid=grid,
        in_specs=[
            pl.BlockSpec((tb, num_inputs), lambda i: (i, 0)),        # x: tiled over batch
            pl.BlockSpec((num_inputs, 2 * H), lambda i: (0, 0)),     # fused W1 (resident)
            pl.BlockSpec((1, 2 * H), lambda i: (0, 0)),              # fused b1
            pl.BlockSpec((2 * H, 2 * H), lambda i: (0, 0)),          # blockdiag W2
            pl.BlockSpec((1, 2 * H), lambda i: (0, 0)),              # fused b2
            pl.BlockSpec((2 * H, A + 1), lambda i: (0, 0)),          # packed W3
            pl.BlockSpec((1, A + 1), lambda i: (0, 0)),              # packed b3
        ],
        out_specs=pl.BlockSpec((tb, A + 1), lambda i: (i, 0)),
        compiler_params=pltpu.CompilerParams(
            dimension_semantics=("parallel",),
        ),
    )(x, w1, b1, w2, b2, w3, b3)

    probs = out[:, :A]
    value = out[:, A:]
    return probs, value


def init_params(key, num_inputs, num_actions, hidden_size):
    """Deterministic PyTorch-style (uniform +-1/sqrt(fan_in)) init."""
    def linear(key, fan_in, fan_out):
        kw, kb = jax.random.split(key)
        bound = 1.0 / jnp.sqrt(fan_in)
        w = jax.random.uniform(kw, (fan_in, fan_out), jnp.float32, -bound, bound)
        b = jax.random.uniform(kb, (1, fan_out), jnp.float32, -bound, bound)
        return w, b

    keys = jax.random.split(key, 6)
    aw1, ab1 = linear(keys[0], num_inputs, hidden_size)
    aw2, ab2 = linear(keys[1], hidden_size, hidden_size)
    aw3, ab3 = linear(keys[2], hidden_size, num_actions)
    cw1, cb1 = linear(keys[3], num_inputs, hidden_size)
    cw2, cb2 = linear(keys[4], hidden_size, hidden_size)
    cw3, cb3 = linear(keys[5], hidden_size, 1)
    return dict(
        aw1=aw1, ab1=ab1, aw2=aw2, ab2=ab2, aw3=aw3, ab3=ab3,
        cw1=cw1, cb1=cb1, cw2=cw2, cb2=cb2, cw3=cw3, cb3=cb3,
    )


def reference_forward(x, p):
    """Pure-JAX reference matching PyTorch semantics."""
    def mlp(x, w1, b1, w2, b2, w3, b3):
        h = jnp.maximum(x @ w1 + b1, 0.0)
        h = jnp.maximum(h @ w2 + b2, 0.0)
        return h @ w3 + b3

    value = mlp(x, p["cw1"], p["cb1"], p["cw2"], p["cb2"], p["cw3"], p["cb3"])
    logits = mlp(x, p["aw1"], p["ab1"], p["aw2"], p["ab2"], p["aw3"], p["ab3"])
    return jax.nn.softmax(logits, axis=-1), value


if __name__ == "__main__":
    num_inputs, num_actions, hidden_size = 16, 4, 32
    batch = 8

    key = jax.random.PRNGKey(0)
    kx, kp = jax.random.split(key)
    x = jax.random.normal(kx, (batch, num_inputs), jnp.float32)
    params = init_params(kp, num_inputs, num_actions, hidden_size)

    probs, value = actor_critic_forward(x, params)
    jax.block_until_ready((probs, value))

    ref_probs, ref_value = reference_forward(x, params)
    assert probs.shape == (batch, num_actions)
    assert value.shape == (batch, 1)
    assert jnp.allclose(probs, ref_probs, atol=1e-5, rtol=1e-5)
    assert jnp.allclose(value, ref_value, atol=1e-5, rtol=1e-5)
    assert jnp.allclose(jnp.sum(probs, axis=-1), 1.0, atol=1e-5)

    print("KERNEL_OK")
</pallas_src>

<mosaic_0001>
module attributes {stable_mosaic.version = 11 : i64} {
  func.func @_actor_critic_kernel(%arg0: i32, %arg1: memref<8x16xf32, #tpu.memory_space<vmem>>, %arg2: memref<16x64xf32, #tpu.memory_space<vmem>>, %arg3: memref<1x64xf32, #tpu.memory_space<vmem>>, %arg4: memref<64x64xf32, #tpu.memory_space<vmem>>, %arg5: memref<1x64xf32, #tpu.memory_space<vmem>>, %arg6: memref<64x5xf32, #tpu.memory_space<vmem>>, %arg7: memref<1x5xf32, #tpu.memory_space<vmem>>, %arg8: memref<8x5xf32, #tpu.memory_space<vmem>>) attributes {dimension_semantics = [#tpu.dimension_semantics<parallel>], iteration_bounds = array<i64: 1>, scalar_prefetch = 0 : i64, scratch_operands = 0 : i64, tpu.core_type = #tpu.core_type<tc>, window_params = [{transform_indices = @transform_0, window_bounds = array<i64: 8, 16>}, {pipeline_mode = #tpu.pipeline_mode<synchronous>, transform_indices = @transform_1, window_bounds = array<i64: 16, 64>}, {pipeline_mode = #tpu.pipeline_mode<synchronous>, transform_indices = @transform_2, window_bounds = array<i64: 1, 64>}, {pipeline_mode = #tpu.pipeline_mode<synchronous>, transform_indices = @transform_3, window_bounds = array<i64: 64, 64>}, {pipeline_mode = #tpu.pipeline_mode<synchronous>, transform_indices = @transform_4, window_bounds = array<i64: 1, 64>}, {pipeline_mode = #tpu.pipeline_mode<synchronous>, transform_indices = @transform_5, window_bounds = array<i64: 64, 5>}, {pipeline_mode = #tpu.pipeline_mode<synchronous>, transform_indices = @transform_6, window_bounds = array<i64: 1, 5>}, {transform_indices = @transform_7, window_bounds = array<i64: 8, 5>}]} {
    %c0 = arith.constant 0 : index
    %c0_0 = arith.constant 0 : index
    %0 = vector.load %arg1[%c0, %c0_0] : memref<8x16xf32, #tpu.memory_space<vmem>>, vector<8x16xf32>
    %c0_1 = arith.constant 0 : index
    %c0_2 = arith.constant 0 : index
    %1 = vector.load %arg2[%c0_1, %c0_2] : memref<16x64xf32, #tpu.memory_space<vmem>>, vector<16x64xf32>
    %cst = arith.constant dense<0.000000e+00> : vector<8x64xf32>
    %2 = tpu.matmul %0, %1, %cst {dimension_numbers = #tpu.dot_dimension_numbers<[1], [0], [0], [1], [0, 0, 1, 1], [], []>} : vector<8x16xf32>, vector<16x64xf32>, vector<8x64xf32> -> vector<8x64xf32>
    %c0_3 = arith.constant 0 : index
    %c0_4 = arith.constant 0 : index
    %3 = vector.load %arg3[%c0_3, %c0_4] : memref<1x64xf32, #tpu.memory_space<vmem>>, vector<1x64xf32>
    %4 = vector.broadcast %3 : vector<1x64xf32> to vector<8x64xf32>
    %5 = arith.addf %2, %4 : vector<8x64xf32>
    %cst_5 = arith.constant 0.000000e+00 : f32
    %6 = vector.broadcast %cst_5 : f32 to vector<8x64xf32>
    %7 = arith.maximumf %5, %6 : vector<8x64xf32>
    %c0_6 = arith.constant 0 : index
    %c0_7 = arith.constant 0 : index
    %8 = vector.load %arg4[%c0_6, %c0_7] : memref<64x64xf32, #tpu.memory_space<vmem>>, vector<64x64xf32>
    %cst_8 = arith.constant dense<0.000000e+00> : vector<8x64xf32>
    %9 = tpu.matmul %7, %8, %cst_8 {dimension_numbers = #tpu.dot_dimension_numbers<[1], [0], [0], [1], [0, 0, 1, 1], [], []>} : vector<8x64xf32>, vector<64x64xf32>, vector<8x64xf32> -> vector<8x64xf32>
    %c0_9 = arith.constant 0 : index
    %c0_10 = arith.constant 0 : index
    %10 = vector.load %arg5[%c0_9, %c0_10] : memref<1x64xf32, #tpu.memory_space<vmem>>, vector<1x64xf32>
    %11 = vector.broadcast %10 : vector<1x64xf32> to vector<8x64xf32>
    %12 = arith.addf %9, %11 : vector<8x64xf32>
    %cst_11 = arith.constant 0.000000e+00 : f32
    %13 = vector.broadcast %cst_11 : f32 to vector<8x64xf32>
    %14 = arith.maximumf %12, %13 : vector<8x64xf32>
    %c0_12 = arith.constant 0 : index
    %c0_13 = arith.constant 0 : index
    %15 = vector.load %arg6[%c0_12, %c0_13] : memref<64x5xf32, #tpu.memory_space<vmem>>, vector<64x5xf32>
    %cst_14 = arith.constant dense<0.000000e+00> : vector<8x5xf32>
    %16 = tpu.matmul %14, %15, %cst_14 {dimension_numbers = #tpu.dot_dimension_numbers<[1], [0], [0], [1], [0, 0, 1, 1], [], []>} : vector<8x64xf32>, vector<64x5xf32>, vector<8x5xf32> -> vector<8x5xf32>
    %c0_15 = arith.constant 0 : index
    %c0_16 = arith.constant 0 : index
    %17 = vector.load %arg7[%c0_15, %c0_16] : memref<1x5xf32, #tpu.memory_space<vmem>>, vector<1x5xf32>
    %18 = vector.broadcast %17 : vector<1x5xf32> to vector<8x5xf32>
    %19 = arith.addf %16, %18 : vector<8x5xf32>
    %20 = tpu.iota {dimensions = array<i32: 1>} : vector<8x5xi32>
    %c4_i32 = arith.constant 4 : i32
    %21 = vector.broadcast %c4_i32 : i32 to vector<8x5xi32>
    %22 = arith.cmpi slt, %20, %21 : vector<8x5xi32>
    %cst_17 = arith.constant 0xFF800000 : f32
    %23 = vector.broadcast %cst_17 : f32 to vector<8x5xf32>
    %24 = arith.select %22, %19, %23 : vector<8x5xi1>, vector<8x5xf32>
    %cst_18 = arith.constant dense<0xFF800000> : vector<8xf32>
    %25 = vector.multi_reduction <maximumf>, %24, %cst_18 [1] : vector<8x5xf32> to vector<8xf32>
    %26 = vector.shape_cast %25 : vector<8xf32> to vector<8x1xf32>
    %27 = vector.broadcast %26 : vector<8x1xf32> to vector<8x5xf32>
    %28 = arith.subf %19, %27 : vector<8x5xf32>
    %29 = math.exp %28 : vector<8x5xf32>
    %cst_19 = arith.constant 0.000000e+00 : f32
    %30 = vector.broadcast %cst_19 : f32 to vector<8x5xf32>
    %31 = arith.select %22, %29, %30 : vector<8x5xi1>, vector<8x5xf32>
    %cst_20 = arith.constant dense<0.000000e+00> : vector<8xf32>
    %32 = vector.multi_reduction <add>, %31, %cst_20 [1] : vector<8x5xf32> to vector<8xf32>
    %33 = vector.shape_cast %32 : vector<8xf32> to vector<8x1xf32>
    %34 = tpu.reciprocal %33 : vector<8x1xf32> -> vector<8x1xf32>
    %35 = vector.broadcast %34 : vector<8x1xf32> to vector<8x5xf32>
    %36 = arith.mulf %31, %35 : vector<8x5xf32>
    %37 = arith.select %22, %36, %19 : vector<8x5xi1>, vector<8x5xf32>
    %c0_21 = arith.constant 0 : index
    %c0_22 = arith.constant 0 : index
    %38 = vector.load %arg8[%c0_21, %c0_22] : memref<8x5xf32, #tpu.memory_space<vmem>>, vector<8x5xf32>
    tpu.vector_store %arg8[%c0_21, %c0_22], %37 {strides = array<i32>} : memref<8x5xf32, #tpu.memory_space<vmem>>, vector<8x5xf32>,
    return
  }
  func.func @transform_0(%arg0: i32) -> (i32, i32) {
    %c0_i32 = arith.constant 0 : i32
    %c0_i32_0 = arith.constant 0 : i32
    return %arg0, %c0_i32 : i32, i32
  }
  func.func @transform_1(%arg0: i32) -> (i32, i32) {
    %c0_i32 = arith.constant 0 : i32
    %c0_i32_0 = arith.constant 0 : i32
    %c0_i32_1 = arith.constant 0 : i32
    return %c0_i32, %c0_i32_0 : i32, i32
  }
  func.func @transform_2(%arg0: i32) -> (i32, i32) {
    %c0_i32 = arith.constant 0 : i32
    %c0_i32_0 = arith.constant 0 : i32
    %c0_i32_1 = arith.constant 0 : i32
    return %c0_i32, %c0_i32_0 : i32, i32
  }
  func.func @transform_3(%arg0: i32) -> (i32, i32) {
    %c0_i32 = arith.constant 0 : i32
    %c0_i32_0 = arith.constant 0 : i32
    %c0_i32_1 = arith.constant 0 : i32
    return %c0_i32, %c0_i32_0 : i32, i32
  }
  func.func @transform_4(%arg0: i32) -> (i32, i32) {
    %c0_i32 = arith.constant 0 : i32
    %c0_i32_0 = arith.constant 0 : i32
    %c0_i32_1 = arith.constant 0 : i32
    return %c0_i32, %c0_i32_0 : i32, i32
  }
  func.func @transform_5(%arg0: i32) -> (i32, i32) {
    %c0_i32 = arith.constant 0 : i32
    %c0_i32_0 = arith.constant 0 : i32
    %c0_i32_1 = arith.constant 0 : i32
    return %c0_i32, %c0_i32_0 : i32, i32
  }
  func.func @transform_6(%arg0: i32) -> (i32, i32) {
    %c0_i32 = arith.constant 0 : i32
    %c0_i32_0 = arith.constant 0 : i32
    %c0_i32_1 = arith.constant 0 : i32
    return %c0_i32, %c0_i32_0 : i32, i32
  }
  func.func @transform_7(%arg0: i32) -> (i32, i32) {
    %c0_i32 = arith.constant 0 : i32
    %c0_i32_0 = arith.constant 0 : i32
    return %arg0, %c0_i32 : i32, i32
  }
}

</mosaic_0001>

<bundles_post_ra>
// kernel: tpu_custom_call.1
= control target key start
LH: loop header
LB: loop body
LE: loop exit
PB: predicated region body
PF: predicated region fallthrough
CT: control target
= control target key end

     0   :  { %12 = vsyncpa [#allocation3], 0  ;;  %s378_s0 = inlined_call_operand.vmem [shape: f32[8,16], index: 0, kind: input, shape index: {}]   ;;  %s379_s1 = inlined_call_operand.hbm [shape: f32[16,64], index: 1, kind: input, shape index: {}]   ;;  %s380_s2 = inlined_call_operand.vmem [shape: f32[1,64], index: 2, kind: input, shape index: {}]   ;;  %s381_s3 = inlined_call_operand.vmem [shape: f32[64,64], index: 3, kind: input, shape index: {}]   ;;  %s382_s4 = inlined_call_operand.vmem [shape: f32[1,64], index: 4, kind: input, shape index: {}]   ;;  %s383_s5 = inlined_call_operand.vmem [shape: f32[64,5], index: 5, kind: input, shape index: {}]   ;;  %s384_s6 = inlined_call_operand.vmem [shape: f32[1,5], index: 6, kind: input, shape index: {}]   ;;  %s385_s7 = inlined_call_operand.hbm [shape: f32[8,5], index: 7, kind: output, shape index: {}]  }
   0x1   :  { %13 = vsyncpa [#allocation4], 0  ;;  %s20_s26 = sshll.u32 %s379_s1, 4  ;;  %s262_s27 = smov [#allocation2]   ;;  %s21_s26 = int_to_ptr.hbm [resolvable:$true] %s20_s26 }
   0x2   :  { %s22_s28 = sshll.u32 %s262_s27, 4  ;;  %s263_s29 = smov 128   ;;  %s23_s28 = int_to_ptr.vmem [resolvable:$true] %s22_s28 }
   0x3   :  { %s264_s30 = smov 8  }
   0x4   :  { %28 = dma.hbm_to_vmem [thread:$0]  %s21_s26, 256, %s23_s28, [#allocation3], %s263_s29, %s263_s29, %s264_s30  }
   0x5   :  { %258 = dma.done.wait [#allocation3], 256  }
   0x6   :  { %259 = vsyncadd [#allocation3], 4294967040  ;;  %v45_v0 = vld [vmem:[#allocation2 + $0x8] sm:$0xff]  ;;  %v44_v1 = vld [vmem:[#allocation2] sm:$0xff]  ;;  %vm50_vm0 = vcmask 130048   ;;  %vm87_vm1 = vcmask 523264   ;;  %v147_v27 = vlaneseq }
   0x7   :  { %68 = vmatpush.msra.mxu0 %v45_v0  ;;  %v43_v2 = vld [vmem:[%s378_s0] sm:$0xff]  ;;  %v82_v3 = vld [vmem:[%s381_s3 + $0x38] sm:$0xff]  ;;  %v81_v4 = vld [vmem:[%s381_s3 + $0x30] sm:$0xff]  ;;  %vm151_vm3 = vcmask 39936   ;;  %s186_s20 = sshll.u32 %s385_s7, 4  ;;  %s187_s20 = int_to_ptr.hbm [resolvable:$true] %s186_s20 }
   0x8   :  { %99 = vmatpush.msra.mxu1 %v82_v3  ;;  %v80_v5 = vld [vmem:[%s381_s3 + $0x28] sm:$0xff]  ;;  %v79_v6 = vld [vmem:[%s381_s3 + $0x20] sm:$0xff]  ;;  %v78_v7 = vld [vmem:[%s381_s3 + $0x18] sm:$0xff]  ;;  %v148_v28 = vand.u32 127, %v147_v27 }
   0x9   :  { %69 = vmatpush.msra.mxu0 %v44_v1  ;;  %v77_v8 = vld [vmem:[%s381_s3 + $0x10] sm:$0xff]  ;;  %v76_v9 = vld [vmem:[%s381_s3 + $0x8] sm:$0xff]  ;;  %v75_v10 = vld [vmem:[%s381_s3] sm:$0xff] }
   0xa   :  { %196 = vmatmul.msk.f32.vlgmr.msra.gmra.mxu0 %vm50_vm0, %v43_v2  ;;  %100 = vmatpush.msra.mxu1 %v81_v4  ;;  %v119_v11 = vld [vmem:[%s383_s5 + $0x38] sm:$0xff]  ;;  %v118_v12 = vld [vmem:[%s383_s5 + $0x30] sm:$0xff]  ;;  %v117_v13 = vld [vmem:[%s383_s5 + $0x28] sm:$0xff]  ;;  %vm149_vm2 = vcmp.lt.s32.totalorder %v148_v28, 4 }
   0xb   :  { %135 = vmatpush.msra.mxu2 %v119_v11  ;;  %v116_v14 = vld [vmem:[%s383_s5 + $0x20] sm:$0xff]  ;;  %v115_v15 = vld [vmem:[%s383_s5 + $0x18] sm:$0xff]  ;;  %v114_v20 = vld [vmem:[%s383_s5 + $0x10] sm:$0xff] }
   0xc   :  { %101 = vmatpush.msra.mxu1 %v80_v5  ;;  %v203_v16 = vld [vmem:[%s380_s2] ss:$0 sm:$0xff]  ;;  %v113_v21 = vld [vmem:[%s383_s5 + $0x8] sm:$0xff] }
   0xd   :  { %136 = vmatpush.msra.mxu2 %v118_v12  ;;  %v112_v22 = vld [vmem:[%s383_s5] sm:$0xff] }
   0xe   :  { %102 = vmatpush.msra.mxu1 %v79_v6  ;;  %v204_v23 = vld [vmem:[%s382_s4] ss:$0 sm:$0xff]  ;;  %s265_s4 = smov [#allocation5]  }
   0xf   :  { %137 = vmatpush.msra.mxu2 %v117_v13  ;;  %v205_v29 = vld [vmem:[%s384_s6] ss:$0 sm:$0xff]  ;;  %s184_s5 = sshll.u32 %s265_s4, 4  ;;  %s185_s5 = int_to_ptr.vmem [resolvable:$true] %s184_s5 }
  0x10   :  { %103 = vmatpush.msra.mxu1 %v78_v7 }
  0x11   :  { %138 = vmatpush.msra.mxu2 %v116_v14 }
  0x12   :  { %104 = vmatpush.msra.mxu1 %v77_v8 }
  0x13   :  { %139 = vmatpush.msra.mxu2 %v115_v15 }
  0x14   :  { %105 = vmatpush.msra.mxu1 %v76_v9 }
  0x15   :  { %140 = vmatpush.msra.mxu2 %v114_v20 }
  0x16   :  { %106 = vmatpush.msra.mxu1 %v75_v10 }
  0x17   :  { %141 = vmatpush.msra.mxu2 %v113_v21 }
  0x19   :  { %142 = vmatpush.msra.mxu2 %v112_v22 }
  0x87   :  { %v71_v17 = vpop.f32.mrf.mxu0 }
  0x88   :  { %v72_v18 = vadd.f32 %v203_v16, %v71_v17 }
  0x8a   :  { %v74_v19 = vmax.f32 %v72_v18, 0.0 }
  0x8c   :  { %197 = vmatmul.msk.f32.vlgmr.msra.gmra.mxu1 %vm87_vm1, %v74_v19 }
 0x109   :  { %v108_v24 = vpop.f32.mrf.mxu1 }
 0x10a   :  { %v109_v25 = vadd.f32 %v204_v23, %v108_v24 }
 0x10c   :  { %v111_v26 = vmax.f32 %v109_v25, 0.0 }
 0x10e   :  { %198 = vmatmul.msk.f32.vlgmr.msra.gmra.mxu2 %vm87_vm1, %v111_v26 }
 0x191   :  { %v144_v30 = vpop.f32.mrf.mxu2 }
 0x192   :  { %v145_v31 = vadd.f32 %v205_v29, %v144_v30 }
 0x194   :  { %v150_v32 = vsel %vm149_vm2, %v145_v31, -inf }
 0x195   :  { %v152_v33 = vsel %vm151_vm3, %v150_v32, -inf }
 0x196   :  { %153 = vmax.xlane.f32.xlu0 %v152_v33 }
 0x209   :  { %v154_v34 = vpop.xlane.xlu0 %153 }
 0x20a   :  { %v155_v35 = vsub.f32 %v145_v31, %v154_v34 }
 0x20c   :  { %v156_v36 = vmul.f32 1.442695, %v155_v35 }
 0x20e   :  { %206 = vpow2.f32 %v156_v36 }
 0x214   :  { %v207_v37 = vpop.eup %206 }
 0x215   :  { %v158_v38 = vsel %vm149_vm2, %v207_v37, 0.0 }
 0x216   :  { %v159_v39 = vsel %vm151_vm3, %v158_v38, 0.0 }
 0x217   :  { %160 = vadd.xlane.f32.xlu0 %v159_v39 }
 0x28a   :  { %v161_v40 = vpop.xlane.xlu0 %160 }
 0x28b   :  { %208 = vrcp.f32 %v161_v40  ;;  %v173_v44 = vand.u32 2147483648, %v161_v40  ;;  %v171_v46 = vand.u32 2147483647, %v161_v40  ;;  %vm167_vm5 = vweird.f32 %v161_v40 }
 0x28d   :  { %v174_v48 = vor.u32 1.1754944e-38, %v173_v44  ;;  %vm172_vm7 = vcmp.eq.f32.partialorder %v171_v46, 8.507059e+37 }
 0x291   :  { %v209_v41 = vpop.eup %208 }
 0x292   :  { %v163_v42 = vmul.f32 %v209_v41, %v161_v40  ;;  %vm168_vm4 = vweird.f32 %v209_v41 }
 0x293   :  { %vm169_vm6 = vmor %vm167_vm5, %vm168_vm4 }
 0x294   :  { %v164_v43 = vsub.f32 1.0, %v163_v42 }
 0x296   :  { %v165_v45 = vmul.f32 %v209_v41, %v164_v43 }
 0x298   :  { %v166_v47 = vadd.f32 %v209_v41, %v165_v45 }
 0x29a   :  { %v170_v49 = vsel %vm169_vm6, %v209_v41, %v166_v47 }
 0x29b   :  { %v175_v50 = vsel %vm172_vm7, %v174_v48, %v170_v49 }
 0x29c   :  { %v176_v51 = vmul.f32 %v175_v50, %v158_v38 }
 0x29e   :  { %v177_v52 = vsel %vm149_vm2, %v176_v51, %v145_v31 }
 0x29f   :  { %178 = vst.msk [vmem:[#allocation5] sm:$0xff] %vm151_vm3, %v177_v52 }
 0x2a0   :  { %189 = dma.vmem_to_hbm [thread:$0]  %s185_s5, 128, %s187_s20, [#allocation4]  }
 0x2a1   :  { %260 = dma.done.wait [#allocation4], 128  }
 0x2a2   :  { %261 = vsyncadd [#allocation4], 4294967168 }
 0x2a3   :  { %194 = vsyncpa [#allocation3], 1 }
 0x2a4   :  { %195 = vsyncpa [#allocation4], 1 }

</bundles_post_ra>
